<compile_context>
chip_gen: v6e
topology: v6e:2x2x1
jax: 0.10.0
libtpu: 0.0.40
codegen_flags: <defaults>
</compile_context>

<pallas_src>
import jax
import jax.numpy as jnp
from jax.experimental import pallas as pl
from jax.experimental.pallas import tpu as pltpu


def mlp_kernel(x_ref, w1_ref, w2_ref, b2_ref, o_ref):
    # fc1 (no bias): bf16 operands, fp32 accumulation on the MXU.
    h = jnp.dot(x_ref[...], w1_ref[...], preferred_element_type=jnp.float32)
    # ReLU in fp32 on the VPU (no bf16 pre-cast before the maximum).
    h = jnp.maximum(h, 0.0)
    # Cast the activation down only for the second MXU pass.
    h = h.astype(w2_ref.dtype)
    # fc2, fp32 accumulation.
    logit = jnp.dot(h, w2_ref[...], preferred_element_type=jnp.float32)
    # Bias add stays in-kernel: it rides a free VALU slot under the MXU.
    logit = logit + b2_ref[...].astype(jnp.float32)
    o_ref[...] = logit.astype(o_ref.dtype)


def _round_up(v, m):
    return (v + m - 1) // m * m


def multipled_model_forward(x, w1, w2, b2, *,
                            compute_dtype=jnp.bfloat16,
                            block_batch=256):
    """x: (B, input_dim) -> logits (B, output_dim), fp32 output.

    w1: (input_dim, hidden_dim), w2: (hidden_dim, output_dim), b2: (1, output_dim).
    """
    B, K = x.shape
    Kw, H = w1.shape
    Hw, N = w2.shape
    assert K == Kw and H == Hw and b2.shape == (1, N)

    # Lane-dense padding: every feature dim becomes a multiple of 128 so the MXU
    # sees full-width tiles and the output store is unmasked.
    K_p = _round_up(K, 128)
    H_p = _round_up(H, 128)
    N_p = _round_up(N, 128)

    # Batch tiling: up to `block_batch` rows per grid step (sublane multiple of 8).
    TM = min(block_batch, _round_up(B, 8))
    B_p = _round_up(B, TM)

    cd = compute_dtype
    x_p = jnp.zeros((B_p, K_p), cd).at[:B, :K].set(x.astype(cd))
    w1_p = jnp.zeros((K_p, H_p), cd).at[:K, :H].set(w1.astype(cd))
    w2_p = jnp.zeros((H_p, N_p), cd).at[:H, :N].set(w2.astype(cd))
    b2_p = jnp.zeros((1, N_p), jnp.float32).at[:, :N].set(b2.astype(jnp.float32))

    grid = (B_p // TM,)

    # Rough VMEM budget: resident weights + double-buffered x/out blocks + intermediates.
    itemsize = jnp.dtype(cd).itemsize
    vmem_est = (
        (K_p * H_p + H_p * N_p) * itemsize + N_p * 4          # resident weights + bias
        + 2 * TM * K_p * itemsize                              # double-buffered x blocks
        + 2 * TM * N_p * 4                                     # double-buffered out blocks
        + 2 * TM * H_p * 4                                     # fp32 intermediates
    )
    vmem_limit = min(max(2 * vmem_est, 32 * 1024 * 1024), 96 * 1024 * 1024)

    cost = pl.CostEstimate(
        flops=2 * B_p * (K_p * H_p + H_p * N_p),
        transcendentals=0,
        bytes_accessed=(x_p.size * itemsize + w1_p.size * itemsize
                        + w2_p.size * itemsize + b2_p.size * 4 + B_p * N_p * 4),
    )

    out_p = pl.pallas_call(
        mlp_kernel,
        out_shape=jax.ShapeDtypeStruct((B_p, N_p), jnp.float32),
        grid=grid,
        in_specs=[
            pl.BlockSpec((TM, K_p), lambda i: (i, 0)),   # x: tiled over batch
            pl.BlockSpec((K_p, H_p), lambda i: (0, 0)),  # w1: resident across grid
            pl.BlockSpec((H_p, N_p), lambda i: (0, 0)),  # w2: resident across grid
            pl.BlockSpec((1, N_p), lambda i: (0, 0)),    # b2: resident across grid
        ],
        out_specs=pl.BlockSpec((TM, N_p), lambda i: (i, 0)),
        compiler_params=pltpu.CompilerParams(
            dimension_semantics=("parallel",),
            vmem_limit_bytes=vmem_limit,
        ),
        cost_estimate=cost,
    )(x_p, w1_p, w2_p, b2_p)

    return out_p[:B, :N]


if __name__ == "__main__":
    # Small shapes consistent with the module's forward.
    batch, input_dim, hidden_dim, output_dim = 8, 32, 32, 16

    key = jax.random.PRNGKey(0)
    kx, kw1, kw2, kb2 = jax.random.split(key, 4)

    x = jax.random.normal(kx, (batch, input_dim), dtype=jnp.float32)
    # Deterministic parameter init (synthetic; PyTorch layout would be the transpose).
    w1 = jax.random.normal(kw1, (input_dim, hidden_dim), dtype=jnp.float32) * 0.1
    w2 = jax.random.normal(kw2, (hidden_dim, output_dim), dtype=jnp.float32) * 0.1
    b2 = jax.random.normal(kb2, (1, output_dim), dtype=jnp.float32) * 0.1

    out = multipled_model_forward(x, w1, w2, b2)
    out = jax.block_until_ready(out)

    # Pure-JAX fp32 reference (bf16 MXU passes with fp32 accumulation -> loose tol).
    ref = jnp.maximum(x @ w1, 0.0) @ w2 + b2
    assert out.shape == (batch, output_dim)
    assert jnp.allclose(out, ref, atol=2e-2, rtol=2e-2), (
        f"max abs err = {jnp.max(jnp.abs(out - ref))}")

    print("KERNEL_OK")
</pallas_src>

<mosaic_0001>
module attributes {stable_mosaic.version = 11 : i64} {
  func.func @mlp_kernel(%arg0: i32, %arg1: memref<8x128xbf16, #tpu.memory_space<vmem>>, %arg2: memref<128x128xbf16, #tpu.memory_space<vmem>>, %arg3: memref<128x128xbf16, #tpu.memory_space<vmem>>, %arg4: memref<1x128xf32, #tpu.memory_space<vmem>>, %arg5: memref<8x128xf32, #tpu.memory_space<vmem>>) attributes {dimension_semantics = [#tpu.dimension_semantics<parallel>], iteration_bounds = array<i64: 1>, scalar_prefetch = 0 : i64, scratch_operands = 0 : i64, tpu.core_type = #tpu.core_type<tc>, window_params = [{transform_indices = @transform_0, window_bounds = array<i64: 8, 128>}, {pipeline_mode = #tpu.pipeline_mode<synchronous>, transform_indices = @transform_1, window_bounds = array<i64: 128, 128>}, {pipeline_mode = #tpu.pipeline_mode<synchronous>, transform_indices = @transform_2, window_bounds = array<i64: 128, 128>}, {pipeline_mode = #tpu.pipeline_mode<synchronous>, transform_indices = @transform_3, window_bounds = array<i64: 1, 128>}, {transform_indices = @transform_4, window_bounds = array<i64: 8, 128>}]} {
    %c0 = arith.constant 0 : index
    %c0_0 = arith.constant 0 : index
    %0 = vector.load %arg1[%c0, %c0_0] : memref<8x128xbf16, #tpu.memory_space<vmem>>, vector<8x128xbf16>
    %c0_1 = arith.constant 0 : index
    %c0_2 = arith.constant 0 : index
    %1 = vector.load %arg2[%c0_1, %c0_2] : memref<128x128xbf16, #tpu.memory_space<vmem>>, vector<128x128xbf16>
    %cst = arith.constant dense<0.000000e+00> : vector<8x128xf32>
    %2 = tpu.matmul %0, %1, %cst {dimension_numbers = #tpu.dot_dimension_numbers<[1], [0], [0], [1], [0, 0, 1, 1], [], []>} : vector<8x128xbf16>, vector<128x128xbf16>, vector<8x128xf32> -> vector<8x128xf32>
    %cst_3 = arith.constant 0.000000e+00 : f32
    %3 = vector.broadcast %cst_3 : f32 to vector<8x128xf32>
    %4 = arith.maximumf %2, %3 : vector<8x128xf32>
    %5 = arith.truncf %4 : vector<8x128xf32> to vector<8x128xbf16>
    %c0_4 = arith.constant 0 : index
    %c0_5 = arith.constant 0 : index
    %6 = vector.load %arg3[%c0_4, %c0_5] : memref<128x128xbf16, #tpu.memory_space<vmem>>, vector<128x128xbf16>
    %cst_6 = arith.constant dense<0.000000e+00> : vector<8x128xf32>
    %7 = tpu.matmul %5, %6, %cst_6 {dimension_numbers = #tpu.dot_dimension_numbers<[1], [0], [0], [1], [0, 0, 1, 1], [], []>} : vector<8x128xbf16>, vector<128x128xbf16>, vector<8x128xf32> -> vector<8x128xf32>
    %c0_7 = arith.constant 0 : index
    %c0_8 = arith.constant 0 : index
    %8 = vector.load %arg4[%c0_7, %c0_8] : memref<1x128xf32, #tpu.memory_space<vmem>>, vector<1x128xf32>
    %9 = vector.broadcast %8 : vector<1x128xf32> to vector<8x128xf32>
    %10 = arith.addf %7, %9 : vector<8x128xf32>
    %c0_9 = arith.constant 0 : index
    %c0_10 = arith.constant 0 : index
    %11 = vector.load %arg5[%c0_9, %c0_10] : memref<8x128xf32, #tpu.memory_space<vmem>>, vector<8x128xf32>
    tpu.vector_store %arg5[%c0_9, %c0_10], %10 {strides = array<i32>} : memref<8x128xf32, #tpu.memory_space<vmem>>, vector<8x128xf32>,
    return
  }
  func.func @transform_0(%arg0: i32) -> (i32, i32) {
    %c0_i32 = arith.constant 0 : i32
    %c0_i32_0 = arith.constant 0 : i32
    return %arg0, %c0_i32 : i32, i32
  }
  func.func @transform_1(%arg0: i32) -> (i32, i32) {
    %c0_i32 = arith.constant 0 : i32
    %c0_i32_0 = arith.constant 0 : i32
    %c0_i32_1 = arith.constant 0 : i32
    return %c0_i32, %c0_i32_0 : i32, i32
  }
  func.func @transform_2(%arg0: i32) -> (i32, i32) {
    %c0_i32 = arith.constant 0 : i32
    %c0_i32_0 = arith.constant 0 : i32
    %c0_i32_1 = arith.constant 0 : i32
    return %c0_i32, %c0_i32_0 : i32, i32
  }
  func.func @transform_3(%arg0: i32) -> (i32, i32) {
    %c0_i32 = arith.constant 0 : i32
    %c0_i32_0 = arith.constant 0 : i32
    %c0_i32_1 = arith.constant 0 : i32
    return %c0_i32, %c0_i32_0 : i32, i32
  }
  func.func @transform_4(%arg0: i32) -> (i32, i32) {
    %c0_i32 = arith.constant 0 : i32
    %c0_i32_0 = arith.constant 0 : i32
    return %arg0, %c0_i32 : i32, i32
  }
}

</mosaic_0001>

<bundles_post_ra>
// kernel: tpu_custom_call.1
= control target key start
LH: loop header
LB: loop body
LE: loop exit
PB: predicated region body
PF: predicated region fallthrough
CT: control target
= control target key end

     0   :  { %9 = vsyncpa [#allocation3], 0  ;;  %s526_s0 = inlined_call_operand.hbm [shape: bf16[8,128], index: 0, kind: input, shape index: {}]   ;;  %s527_s1 = inlined_call_operand.hbm [shape: bf16[128,128], index: 1, kind: input, shape index: {}]   ;;  %s528_s2 = inlined_call_operand.hbm [shape: bf16[128,128], index: 2, kind: input, shape index: {}]   ;;  %s529_s3 = inlined_call_operand.vmem [shape: f32[1,128], index: 3, kind: input, shape index: {}]   ;;  %s530_s4 = inlined_call_operand.hbm [shape: f32[8,128], index: 4, kind: output, shape index: {}]  }
   0x1   :  { %10 = vsyncpa [#allocation6], 0 }
   0x2   :  { %11 = vsyncpa [#allocation4], 0  ;;  %s478_s15 = smov [#allocation5]  }
   0x3   :  { %s27_s16 = sshll.u32 %s478_s15, 4  ;;  %s28_s16 = int_to_ptr.vmem [resolvable:$true] %s27_s16 }
   0x4   :  { %s400_s17 = scalar_lea.vmem %s28_s16, 1024  ;;  %p405_p1 = scmp.lt.s32.totalorder %s28_s16, %s28_s16 }
   0x5   :  { %p401_p0 = scmp.ne.s32.totalorder %s28_s16, %s400_s17  ;;  %p406_p2 = scmp.lt.s32.totalorder %s400_s17, %s400_s17 }
   0x7   :  { %p407_p3 = por %p406_p2, %p405_p1 }
   0x9   :  { %p408_p4 = pnand %p407_p3, %p401_p0 }
   0xb   :  { %411 = shalt.err (!%p408_p4)
}
   0xc   :  { %s479_s18 = smov 64   ;;  %s480_s19 = smov 4  }
   0xd   :  { %33 = dma.hbm_to_vmem [thread:$0]  %s527_s1, 1024, %s28_s16, [#allocation6], %s479_s18, %s479_s18, %s480_s19  }
   0xe   :  { %s481_s22 = smov [#allocation2]   ;;  %s482_s24 = smov [#allocation7]  }
   0xf   :  { %s18_s23 = sshll.u32 %s481_s22, 4  ;;  %s39_s25 = sshll.u32 %s482_s24, 4  ;;  %s19_s23 = int_to_ptr.vmem [resolvable:$true] %s18_s23  ;;  %s40_s25 = int_to_ptr.vmem [resolvable:$true] %s39_s25 }
  0x10   :  { %s420_s26 = scalar_lea.vmem %s19_s23, 64  ;;  %p425_p6 = scmp.lt.s32.totalorder %s19_s23, %s19_s23 }
  0x11   :  { %p421_p5 = scmp.ne.s32.totalorder %s19_s23, %s420_s26  ;;  %p426_p7 = scmp.lt.s32.totalorder %s420_s26, %s420_s26 }
  0x13   :  { %p427_p8 = por %p426_p7, %p425_p6 }
  0x15   :  { %p428_p9 = pnand %p427_p8, %p421_p5 }
  0x17   :  { %431 = shalt.err (!%p428_p9)
}
  0x18   :  { %21 = dma.hbm_to_vmem [thread:$0]  %s526_s0, 64, %s19_s23, [#allocation3]  }
  0x19   :  { %s440_s29 = scalar_lea.vmem %s40_s25, 1024  ;;  %p445_p11 = scmp.lt.s32.totalorder %s40_s25, %s40_s25 }
  0x1a   :  { %p441_p10 = scmp.ne.s32.totalorder %s40_s25, %s440_s29  ;;  %p446_p12 = scmp.lt.s32.totalorder %s440_s29, %s440_s29 }
  0x1c   :  { %p447_p13 = por %p446_p12, %p445_p11 }
  0x1e   :  { %p448_p0 = pnand %p447_p13, %p441_p10 }
  0x20   :  { %451 = shalt.err (!%p448_p0)
}
  0x21   :  { %45 = dma.hbm_to_vmem [thread:$0]  %s528_s2, 1024, %s40_s25, [#allocation6], %s479_s18, %s479_s18, %s480_s19  }
  0x22   :  { %472 = dma.done.wait [#allocation3], 64  }
  0x23   :  { %473 = vsyncadd [#allocation3], 4294967232 }
  0x24   :  { %474 = dma.done.wait [#allocation6], 2048  }
  0x25   :  { %475 = vsyncadd [#allocation6], 4294965248  ;;  %v483_v0 = vmov 0.0   ;;  %vm484_vm0 = vmmov 0   ;;  %v376_v1 = vld [vmem:[#allocation5 + $0x38] sm:$0xff]   ;;  %v377_v2 = vld [vmem:[#allocation5 + $0x30] sm:$0xff]  }
  0x26   :  { %328 = vmatprep.subr.bf16.mxu0 %v483_v0  ;;  %344 = vmatprep.mubr.msk.bf16.mxu0 %vm484_vm0, %v483_v0  ;;  %v378_v3 = vld [vmem:[#allocation5 + $0x28] sm:$0xff]   ;;  %v384_v4 = vld [vmem:[#allocation7 + $0x38] sm:$0xff]   ;;  %v379_v5 = vld [vmem:[#allocation5 + $0x20] sm:$0xff]   ;;  %s485_s5 = smov [#allocation8]  }
  0x27   :  { %348 = vmatprep.subr.bf16.mxu1 %v483_v0  ;;  %364 = vmatprep.mubr.msk.bf16.mxu1 %vm484_vm0, %v483_v0  ;;  %v385_v6 = vld [vmem:[#allocation7 + $0x30] sm:$0xff]   ;;  %v380_v7 = vld [vmem:[#allocation5 + $0x18] sm:$0xff]   ;;  %v386_v8 = vld [vmem:[#allocation7 + $0x28] sm:$0xff]   ;;  %s283_s6 = sshll.u32 %s485_s5, 4  ;;  %s284_s6 = int_to_ptr.vmem [resolvable:$true] %s283_s6 }
  0x28   :  { %329 = vmatpush3.bf16.msra.mxu0 %v376_v1  ;;  %349 = vmatpush3.bf16.msra.mxu1 %v384_v4  ;;  %v381_v9 = vld [vmem:[#allocation5 + $0x10] sm:$0xff]   ;;  %v387_v10 = vld [vmem:[#allocation7 + $0x20] sm:$0xff]   ;;  %v382_v11 = vld [vmem:[#allocation5 + $0x8] sm:$0xff]   ;;  %s452_s7 = scalar_lea.vmem %s284_s6, 128  ;;  %p457_p2 = scmp.lt.s32.totalorder %s284_s6, %s284_s6 }
  0x29   :  { %330 = vmatprep.subr.bf16.mxu0 %v483_v0  ;;  %350 = vmatprep.subr.bf16.mxu1 %v483_v0  ;;  %v388_v12 = vld [vmem:[#allocation7 + $0x18] sm:$0xff]   ;;  %v383_v13 = vld [vmem:[#allocation5] sm:$0xff]   ;;  %v389_v14 = vld [vmem:[#allocation7 + $0x10] sm:$0xff]   ;;  %p453_p1 = scmp.ne.s32.totalorder %s284_s6, %s452_s7  ;;  %p458_p3 = scmp.lt.s32.totalorder %s452_s7, %s452_s7 }
  0x2a   :  { %v58_v15 = vld [vmem:[#allocation2] sm:$0xf]  ;;  %v390_v16 = vld [vmem:[#allocation7 + $0x8] sm:$0xff]   ;;  %v391_v17 = vld [vmem:[#allocation7] sm:$0xff]  }
  0x2b   :  { %v301_v24 = vld [vmem:[%s529_s3] ss:$0 sm:$0xff]  ;;  %p459_p4 = por %p458_p3, %p457_p2 }
  0x2c   :  { %331 = vmatpush3.bf16.msra.mxu0 %v377_v2  ;;  %351 = vmatpush3.bf16.msra.mxu1 %v385_v6 }
  0x2d   :  { %332 = vmatprep.subr.bf16.mxu0 %v483_v0  ;;  %352 = vmatprep.subr.bf16.mxu1 %v483_v0  ;;  %p460_p5 = pnand %p459_p4, %p453_p1 }
  0x30   :  { %333 = vmatpush3.bf16.msra.mxu0 %v378_v3  ;;  %353 = vmatpush3.bf16.msra.mxu1 %v386_v8 }
  0x31   :  { %334 = vmatprep.subr.bf16.mxu0 %v483_v0  ;;  %354 = vmatprep.subr.bf16.mxu1 %v483_v0 }
  0x34   :  { %335 = vmatpush3.bf16.msra.mxu0 %v379_v5  ;;  %355 = vmatpush3.bf16.msra.mxu1 %v387_v10 }
  0x35   :  { %336 = vmatprep.subr.bf16.mxu0 %v483_v0  ;;  %356 = vmatprep.subr.bf16.mxu1 %v483_v0 }
  0x38   :  { %337 = vmatpush3.bf16.msra.mxu0 %v380_v7  ;;  %357 = vmatpush3.bf16.msra.mxu1 %v388_v12 }
  0x39   :  { %338 = vmatprep.subr.bf16.mxu0 %v483_v0  ;;  %358 = vmatprep.subr.bf16.mxu1 %v483_v0 }
  0x3c   :  { %339 = vmatpush3.bf16.msra.mxu0 %v381_v9  ;;  %359 = vmatpush3.bf16.msra.mxu1 %v389_v14 }
  0x3d   :  { %340 = vmatprep.subr.bf16.mxu0 %v483_v0  ;;  %360 = vmatprep.subr.bf16.mxu1 %v483_v0 }
  0x40   :  { %341 = vmatpush3.bf16.msra.mxu0 %v382_v11  ;;  %361 = vmatpush3.bf16.msra.mxu1 %v390_v16 }
  0x41   :  { %342 = vmatprep.subr.bf16.mxu0 %v483_v0  ;;  %362 = vmatprep.subr.bf16.mxu1 %v483_v0 }
  0x44   :  { %343 = vmatpush3.bf16.msra.mxu0 %v383_v13  ;;  %363 = vmatpush3.bf16.msra.mxu1 %v391_v17 }
  0x47   :  { %345 = vmatmul.mubr.bf16.vlgmr.msra.gmra.mxu0 %v58_v15 }
 0x107   :  { %v157_v18 = vpop.f32.mrf.mxu0 }
 0x108   :  { %v163_v19 = vmax.f32 %v157_v18, 0.0 }
 0x109   :  { %v346_v20 = vpop.f32.mrf.mxu0 }
 0x10a   :  { %v164_v21 = vpack.c.bf16 %v163_v19, %v163_v19 }
 0x10b   :  { %v160_v22 = vpop.f32.mrf.mxu0 }
 0x10c   :  { %365 = vmatmul.mubr.bf16.vlgmr.msra.gmra.mxu1 %v164_v21 }
 0x10d   :  { %v347_v23 = vpop.f32.mrf.mxu0 }
 0x1cc   :  { %v270_v25 = vpop.f32.mrf.mxu1 }
 0x1cd   :  { %v271_v26 = vadd.f32 %v301_v24, %v270_v25 }
 0x1ce   :  { %v366_v27 = vpop.f32.mrf.mxu1 }
 0x1cf   :  { %276 = vst [vmem:[#allocation8] sm:$0xff] %v271_v26 }
 0x1d0   :  { %v273_v28 = vpop.f32.mrf.mxu1 }
 0x1d1   :  { %463 = shalt.err (!%p460_p5)
}
 0x1d2   :  { %286 = dma.vmem_to_hbm [thread:$0]  %s284_s6, 128, %s530_s4, [#allocation4]   ;;  %v367_v29 = vpop.f32.mrf.mxu1 }
 0x1d3   :  { %476 = dma.done.wait [#allocation4], 128  }
 0x1d4   :  { %477 = vsyncadd [#allocation4], 4294967168 }
 0x1d5   :  { %290 = vsyncpa [#allocation3], 1 }
 0x1d6   :  { %291 = vsyncpa [#allocation6], 1 }
 0x1d7   :  { %292 = vsyncpa [#allocation4], 1 }

</bundles_post_ra>
